<compile_context>
chip_gen: v6e
topology: v6e:2x2x1
jax: 0.10.0
libtpu: 0.0.40
codegen_flags: <defaults>
</compile_context>

<pallas_src>
import functools
import math

import jax
import jax.numpy as jnp
import numpy as np
from jax.experimental import pallas as pl
from jax.experimental.pallas import tpu as pltpu

_INV_SQRT2 = 0.7071067811865476
_GELU_C0 = 0.7978845608028654   # sqrt(2 / pi)
_GELU_C1 = 0.044715


def _mlp_kernel(x_ref, wfc_ref, bfc_ref, wproj_ref, bproj_ref, o_ref, acc_ref,
                *, exact_gelu: bool):
    # Per grid step (i, k):
    #   x_ref:     (TM, E)   resident across k      wfc_ref:   (E, TI)  streamed
    #   bfc_ref:   (1, TI)   streamed                wproj_ref: (TI, E)  streamed
    #   bproj_ref: (1, E)    resident                o_ref:     (TM, E)  resident
    #   acc_ref:   (TM, E)   f32 VMEM scratch accumulator
    k = pl.program_id(1)

    @pl.when(k == 0)
    def _():
        acc_ref[...] = jnp.zeros_like(acc_ref)

    # First matmul at the weights' dtype (bf16 path keeps the MXU at bf16 rate);
    # f32 accumulation via preferred_element_type.
    x = x_ref[...].astype(wfc_ref.dtype)
    h = jnp.dot(x, wfc_ref[...], preferred_element_type=jnp.float32)
    h = h + bfc_ref[...].astype(jnp.float32)

    if exact_gelu:
        # Exact GELU (nn.GELU() default): 0.5*h*(1+erf(h/sqrt(2))).
        h = 0.5 * h * (1.0 + jax.lax.erf(h * _INV_SQRT2))
    else:
        # tanh-approximate GELU: transcendental goes to the EUP slot instead of
        # a long erf polynomial on the VPU.
        h = 0.5 * h * (1.0 + jnp.tanh(_GELU_C0 * (h + _GELU_C1 * h * h * h)))

    # c_proj partial sum: (TM, E) += (TM, TI) @ (TI, E).
    acc_ref[...] += jnp.dot(h.astype(wproj_ref.dtype), wproj_ref[...],
                            preferred_element_type=jnp.float32)

    @pl.when(k == pl.num_programs(1) - 1)
    def _():
        # TODO(synk): training-mode dropout (resid_pdrop) omitted; inference = identity.
        o_ref[...] = (acc_ref[...] + bproj_ref[...].astype(jnp.float32)
                      ).astype(o_ref.dtype)


def prepare_mlp_params(w_fc, b_fc, w_proj, b_proj, dtype=jnp.bfloat16):
    """One-time conversion from PyTorch nn.Linear layout (out, in) to the
    (in, out) layout the kernel consumes.  Do this at init, NOT per forward
    call, so the forward never pays an HBM weight transpose.  Weights are
    cast to bf16 by default (~2-3x MXU rate, half the HBM weight bytes on
    every generation); pass dtype=None to keep f32.  Biases stay f32."""
    wfc_t = jnp.asarray(w_fc).T                     # (E, I)
    wproj_t = jnp.asarray(w_proj).T                 # (I, E)
    bfc2d = jnp.asarray(b_fc).reshape(1, -1).astype(jnp.float32)      # (1, I)
    bproj2d = jnp.asarray(b_proj).reshape(1, -1).astype(jnp.float32)  # (1, E)
    if dtype is not None:
        wfc_t = wfc_t.astype(dtype)
        wproj_t = wproj_t.astype(dtype)
    return wfc_t, bfc2d, wproj_t, bproj2d


def _pick_tiles(M, I, tm, ti):
    """Clamp / align tiles; keep >=2 row blocks so both v7x TCs get work."""
    tm = max(1, min(tm, M))
    ti = max(1, min(ti, I))
    if pl.cdiv(M, tm) < 2 and M >= 16:     # megacore: don't leave a TC idle
        tm = M // 2
    if tm != M and tm % 8:                 # (8, 128) layout rule
        tm = max(8, (tm // 8) * 8)
    if ti != I and ti % 128:
        ti = max(128, (ti // 128) * 128)
    return tm, ti


def _vmem_limit_bytes(tm, ti, E, I, x_dtype, w_dtype, out_dtype):
    """Request only what the double-buffered blocks need, capped below the
    chip's physical VMEM (v7x has 64 MiB total; v5e/v6e have 128 MiB)."""
    xb = jnp.dtype(x_dtype).itemsize
    wb = jnp.dtype(w_dtype).itemsize
    ob = jnp.dtype(out_dtype).itemsize
    blocks = (tm * E * xb            # x tile
              + E * ti * wb          # Wfc slice
              + ti * E * wb          # Wproj slice
              + tm * E * ob          # output tile
              + ti * 4 + E * 4)      # bias slices (f32)
    need = 2 * blocks + tm * E * 4 + (4 << 20)   # double-buffer + f32 acc + headroom
    try:
        cap = int(pltpu.get_tpu_info().vmem_capacity_bytes)
    except Exception:
        cap = 64 * 1024 * 1024
    return int(min(max(need, 32 * 1024 * 1024), cap * 7 // 8))


@functools.partial(jax.jit, static_argnames=("tm", "ti", "exact_gelu"))
def decoder_only_mlp(hidden_states, wfc_t, bfc2d, wproj_t, bproj2d, *,
                     tm=512, ti=512, exact_gelu=False):
    """hidden_states: (B, S, E).  wfc_t: (E, I), bfc2d: (1, I),
    wproj_t: (I, E), bproj2d: (1, E) — from prepare_mlp_params."""
    B, S, E = hidden_states.shape
    I = wfc_t.shape[1]
    M = B * S

    tm, ti = _pick_tiles(M, I, tm, ti)
    x2d = hidden_states.reshape(M, E)
    grid = (pl.cdiv(M, tm), pl.cdiv(I, ti))

    x_bytes = jnp.dtype(hidden_states.dtype).itemsize
    w_bytes = jnp.dtype(wfc_t.dtype).itemsize
    cost = pl.CostEstimate(
        flops=4 * M * E * I,                              # two matmuls
        transcendentals=M * I,                            # gelu
        bytes_accessed=(2 * M * E * x_bytes               # x in, y out
                        + 2 * E * I * w_bytes * grid[0]   # weights re-streamed / row tile
                        + (I + E) * 4),                   # biases (f32)
    )

    kernel = functools.partial(_mlp_kernel, exact_gelu=exact_gelu)

    out = pl.pallas_call(
        kernel,
        out_shape=jax.ShapeDtypeStruct((M, E), hidden_states.dtype),
        grid_spec=pltpu.PrefetchScalarGridSpec(
            num_scalar_prefetch=0,
            grid=grid,
            in_specs=[
                pl.BlockSpec((tm, E), lambda i, k: (i, 0)),   # x rows (resident over k)
                pl.BlockSpec((E, ti), lambda i, k: (0, k)),   # Wfc column slice (streamed)
                pl.BlockSpec((1, ti), lambda i, k: (0, k)),   # bfc slice
                pl.BlockSpec((ti, E), lambda i, k: (k, 0)),   # Wproj row slice (streamed)
                pl.BlockSpec((1, E), lambda i, k: (0, 0)),    # bproj (resident)
            ],
            out_specs=pl.BlockSpec((tm, E), lambda i, k: (i, 0)),
            scratch_shapes=[pltpu.VMEM((tm, E), jnp.float32)],
        ),
        compiler_params=pltpu.CompilerParams(
            dimension_semantics=("parallel", "arbitrary"),
            vmem_limit_bytes=_vmem_limit_bytes(
                tm, ti, E, I, hidden_states.dtype, wfc_t.dtype,
                hidden_states.dtype),
        ),
        cost_estimate=cost,
    )(x2d, wfc_t, bfc2d, wproj_t, bproj2d)

    return out.reshape(B, S, E)


_erf = np.vectorize(math.erf)


def _reference_numpy(x, w_fc, b_fc, w_proj, b_proj):
    """Ground-truth forward (float64, exact erf GELU, identity dropout)."""
    x64 = np.asarray(x, dtype=np.float64)
    wfc = np.asarray(w_fc, dtype=np.float64)
    bfc = np.asarray(b_fc, dtype=np.float64)
    wproj = np.asarray(w_proj, dtype=np.float64)
    bproj = np.asarray(b_proj, dtype=np.float64)
    h = x64 @ wfc.T + bfc
    h = 0.5 * h * (1.0 + _erf(h * _INV_SQRT2))
    return h @ wproj.T + bproj


if __name__ == "__main__":
    # Small config: n_embd=32, n_inner=128 (4x), batch=2, seq=8
    B, S, E, I = 2, 8, 32, 128

    key = jax.random.PRNGKey(0)
    k_x, k_wfc, k_bfc, k_wproj, k_bproj = jax.random.split(key, 5)

    x = jax.random.normal(k_x, (B, S, E), dtype=jnp.float32)
    # PyTorch nn.Linear layouts: weight (out, in), bias (out,)
    w_fc = jax.random.normal(k_wfc, (I, E), dtype=jnp.float32) * 0.02
    b_fc = jax.random.normal(k_bfc, (I,), dtype=jnp.float32) * 0.02
    w_proj = jax.random.normal(k_wproj, (E, I), dtype=jnp.float32) * 0.02
    b_proj = jax.random.normal(k_bproj, (E,), dtype=jnp.float32) * 0.02

    y_ref = _reference_numpy(x, w_fc, b_fc, w_proj, b_proj)

    # 1) f32 weights + exact erf GELU: validates tiling / accumulation tightly.
    params_f32 = prepare_mlp_params(w_fc, b_fc, w_proj, b_proj, dtype=None)
    y_exact = jax.block_until_ready(
        decoder_only_mlp(x, *params_f32, exact_gelu=True))
    assert y_exact.shape == (B, S, E)
    err = float(np.max(np.abs(np.asarray(y_exact, dtype=np.float64) - y_ref)))
    assert err < 5e-3, f"f32/exact-gelu path mismatch: max abs err {err}"

    # 2) Default fast path: bf16 weights + tanh-approximate GELU (looser tol).
    params_bf16 = prepare_mlp_params(w_fc, b_fc, w_proj, b_proj)
    y_fast = jax.block_until_ready(decoder_only_mlp(x, *params_bf16))
    assert y_fast.shape == (B, S, E)
    err = float(np.max(np.abs(np.asarray(y_fast, dtype=np.float64) - y_ref)))
    assert err < 2e-2, f"bf16/tanh-gelu path mismatch: max abs err {err}"

    print("KERNEL_OK")
</pallas_src>

<mosaic_0001>
module attributes {stable_mosaic.version = 11 : i64} {
  func.func @_mlp_kernel(%arg0: i32, %arg1: i32, %arg2: memref<8x32xf32, #tpu.memory_space<vmem>>, %arg3: memref<32x128xf32, #tpu.memory_space<vmem>>, %arg4: memref<1x128xf32, #tpu.memory_space<vmem>>, %arg5: memref<128x32xf32, #tpu.memory_space<vmem>>, %arg6: memref<1x32xf32, #tpu.memory_space<vmem>>, %arg7: memref<8x32xf32, #tpu.memory_space<vmem>>, %arg8: memref<8x32xf32, #tpu.memory_space<vmem>>) attributes {dimension_semantics = [#tpu.dimension_semantics<parallel>, #tpu.dimension_semantics<arbitrary>], iteration_bounds = array<i64: 2, 1>, scalar_prefetch = 0 : i64, scratch_operands = 1 : i64, tpu.core_type = #tpu.core_type<tc>, window_params = [{transform_indices = @transform_0, window_bounds = array<i64: 8, 32>}, {transform_indices = @transform_1, window_bounds = array<i64: 32, 128>}, {transform_indices = @transform_2, window_bounds = array<i64: 1, 128>}, {transform_indices = @transform_3, window_bounds = array<i64: 128, 32>}, {pipeline_mode = #tpu.pipeline_mode<synchronous>, transform_indices = @transform_4, window_bounds = array<i64: 1, 32>}, {transform_indices = @transform_5, window_bounds = array<i64: 8, 32>}]} {
    %c0_i32 = arith.constant 0 : i32
    %0 = arith.cmpi eq, %arg1, %c0_i32 : i32
    %1 = arith.extui %0 : i1 to i32
    %c0_i32_0 = arith.constant 0 : i32
    %2 = arith.cmpi ne, %1, %c0_i32_0 : i32
    scf.if %2 {
      %cst_18 = arith.constant 0.000000e+00 : f32
      %25 = vector.broadcast %cst_18 : f32 to vector<8x32xf32>
      %c0_19 = arith.constant 0 : index
      %c0_20 = arith.constant 0 : index
      %26 = vector.load %arg8[%c0_19, %c0_20] : memref<8x32xf32, #tpu.memory_space<vmem>>, vector<8x32xf32>
      tpu.vector_store %arg8[%c0_19, %c0_20], %25 {strides = array<i32>} : memref<8x32xf32, #tpu.memory_space<vmem>>, vector<8x32xf32>,
    } else {
    }
    %c0 = arith.constant 0 : index
    %c0_1 = arith.constant 0 : index
    %3 = vector.load %arg2[%c0, %c0_1] : memref<8x32xf32, #tpu.memory_space<vmem>>, vector<8x32xf32>
    %c0_2 = arith.constant 0 : index
    %c0_3 = arith.constant 0 : index
    %4 = vector.load %arg3[%c0_2, %c0_3] : memref<32x128xf32, #tpu.memory_space<vmem>>, vector<32x128xf32>
    %cst = arith.constant dense<0.000000e+00> : vector<8x128xf32>
    %5 = tpu.matmul %3, %4, %cst {dimension_numbers = #tpu.dot_dimension_numbers<[1], [0], [0], [1], [0, 0, 1, 1], [], []>} : vector<8x32xf32>, vector<32x128xf32>, vector<8x128xf32> -> vector<8x128xf32>
    %c0_4 = arith.constant 0 : index
    %c0_5 = arith.constant 0 : index
    %6 = vector.load %arg4[%c0_4, %c0_5] : memref<1x128xf32, #tpu.memory_space<vmem>>, vector<1x128xf32>
    %7 = vector.broadcast %6 : vector<1x128xf32> to vector<8x128xf32>
    %8 = arith.addf %5, %7 : vector<8x128xf32>
    %cst_6 = arith.constant 5.000000e-01 : f32
    %9 = vector.broadcast %cst_6 : f32 to vector<8x128xf32>
    %10 = arith.mulf %9, %8 : vector<8x128xf32>
    %cst_7 = arith.constant 0.707106769 : f32
    %11 = vector.broadcast %cst_7 : f32 to vector<8x128xf32>
    %12 = arith.mulf %8, %11 : vector<8x128xf32>
    %13 = math.erf %12 : vector<8x128xf32>
    %cst_8 = arith.constant 1.000000e+00 : f32
    %14 = vector.broadcast %cst_8 : f32 to vector<8x128xf32>
    %15 = arith.addf %14, %13 : vector<8x128xf32>
    %16 = arith.mulf %10, %15 : vector<8x128xf32>
    %c0_9 = arith.constant 0 : index
    %c0_10 = arith.constant 0 : index
    %17 = vector.load %arg8[%c0_9, %c0_10] : memref<8x32xf32, #tpu.memory_space<vmem>>, vector<8x32xf32>
    %c0_11 = arith.constant 0 : index
    %c0_12 = arith.constant 0 : index
    %18 = vector.load %arg5[%c0_11, %c0_12] : memref<128x32xf32, #tpu.memory_space<vmem>>, vector<128x32xf32>
    %cst_13 = arith.constant dense<0.000000e+00> : vector<8x32xf32>
    %19 = tpu.matmul %16, %18, %cst_13 {dimension_numbers = #tpu.dot_dimension_numbers<[1], [0], [0], [1], [0, 0, 1, 1], [], []>} : vector<8x128xf32>, vector<128x32xf32>, vector<8x32xf32> -> vector<8x32xf32>
    %20 = arith.addf %17, %19 : vector<8x32xf32>
    %c0_14 = arith.constant 0 : index
    %c0_15 = arith.constant 0 : index
    %21 = vector.load %arg8[%c0_14, %c0_15] : memref<8x32xf32, #tpu.memory_space<vmem>>, vector<8x32xf32>
    tpu.vector_store %arg8[%c0_14, %c0_15], %20 {strides = array<i32>} : memref<8x32xf32, #tpu.memory_space<vmem>>, vector<8x32xf32>,
    %c0_i32_16 = arith.constant 0 : i32
    %22 = arith.cmpi eq, %arg1, %c0_i32_16 : i32
    %23 = arith.extui %22 : i1 to i32
    %c0_i32_17 = arith.constant 0 : i32
    %24 = arith.cmpi ne, %23, %c0_i32_17 : i32
    scf.if %24 {
      %c0_18 = arith.constant 0 : index
      %c0_19 = arith.constant 0 : index
      %25 = vector.load %arg8[%c0_18, %c0_19] : memref<8x32xf32, #tpu.memory_space<vmem>>, vector<8x32xf32>
      %c0_20 = arith.constant 0 : index
      %c0_21 = arith.constant 0 : index
      %26 = vector.load %arg6[%c0_20, %c0_21] : memref<1x32xf32, #tpu.memory_space<vmem>>, vector<1x32xf32>
      %27 = vector.broadcast %26 : vector<1x32xf32> to vector<8x32xf32>
      %28 = arith.addf %25, %27 : vector<8x32xf32>
      %c0_22 = arith.constant 0 : index
      %c0_23 = arith.constant 0 : index
      %29 = vector.load %arg7[%c0_22, %c0_23] : memref<8x32xf32, #tpu.memory_space<vmem>>, vector<8x32xf32>
      tpu.vector_store %arg7[%c0_22, %c0_23], %28 {strides = array<i32>} : memref<8x32xf32, #tpu.memory_space<vmem>>, vector<8x32xf32>,
    } else {
    }
    return
  }
  func.func @transform_0(%arg0: i32, %arg1: i32) -> (i32, i32) {
    %c0_i32 = arith.constant 0 : i32
    %c0_i32_0 = arith.constant 0 : i32
    return %arg0, %c0_i32 : i32, i32
  }
  func.func @transform_1(%arg0: i32, %arg1: i32) -> (i32, i32) {
    %c0_i32 = arith.constant 0 : i32
    %c0_i32_0 = arith.constant 0 : i32
    return %c0_i32, %arg1 : i32, i32
  }
  func.func @transform_2(%arg0: i32, %arg1: i32) -> (i32, i32) {
    %c0_i32 = arith.constant 0 : i32
    %c0_i32_0 = arith.constant 0 : i32
    return %c0_i32, %arg1 : i32, i32
  }
  func.func @transform_3(%arg0: i32, %arg1: i32) -> (i32, i32) {
    %c0_i32 = arith.constant 0 : i32
    %c0_i32_0 = arith.constant 0 : i32
    return %arg1, %c0_i32 : i32, i32
  }
  func.func @transform_4(%arg0: i32, %arg1: i32) -> (i32, i32) {
    %c0_i32 = arith.constant 0 : i32
    %c0_i32_0 = arith.constant 0 : i32
    %c0_i32_1 = arith.constant 0 : i32
    return %c0_i32, %c0_i32_0 : i32, i32
  }
  func.func @transform_5(%arg0: i32, %arg1: i32) -> (i32, i32) {
    %c0_i32 = arith.constant 0 : i32
    %c0_i32_0 = arith.constant 0 : i32
    return %arg0, %c0_i32 : i32, i32
  }
}

</mosaic_0001>

<bundles_post_ra>
// kernel: decoder_only_mlp.1
= control target key start
LH: loop header
LB: loop body
LE: loop exit
PB: predicated region body
PF: predicated region fallthrough
CT: control target
= control target key end

     0   :  { %10 = vsyncpa [#allocation4], 0  ;;  %s1056_s0 = inlined_call_operand.vmem [shape: f32[16,32], index: 0, kind: input, shape index: {}]   ;;  %s1057_s1 = inlined_call_operand.vmem [shape: f32[32,128], index: 1, kind: input, shape index: {}]   ;;  %s1058_s2 = inlined_call_operand.vmem [shape: f32[1,128], index: 2, kind: input, shape index: {}]   ;;  %s1059_s3 = inlined_call_operand.vmem [shape: f32[128,32], index: 3, kind: input, shape index: {}]   ;;  %s1060_s4 = inlined_call_operand.vmem [shape: f32[1,32], index: 4, kind: input, shape index: {}]   ;;  %s1061_s5 = inlined_call_operand.hbm [shape: f32[16,32], index: 5, kind: output, shape index: {}]  }
   0x1   :  { %12 = vsyncpa [#allocation4 + $0x1], 0  ;;  %s862_s18 = smov 0   ;;  %s864_s19 = smov 0  }
   0x2   :  { %s866_s20 = smov 0   ;;  %s868_s21 = smov 0  }
   0x3   :  { %s870_s22 = smov 0   ;;  %s872_s23 = smov 0  }
   0x4 LB: > { %s607_s24 = sadd.s32 4294967295, %s827_s23   ;;  %s608_s25 = sadd.s32 4294967294, %s827_s23   ;;  %s827_s23 = sphi %s872_s23, %s18_s23   ;;  %s823_s22 = sphi %s870_s22, %s1068_s22   ;;  %s819_s21 = sphi %s868_s21, %s1067_s21   ;;  %s815_s20 = sphi %s866_s20, %s1066_s20   ;;  %s811_s19 = sphi %s864_s19, %s1065_s19   ;;  %s807_s18 = sphi %s862_s18, %s1064_s18  }
   0x5   : > { %s30_s26 = sadd.s32 1, %s823_s22  ;;  %s162_s27 = sadd.s32 1, %s815_s20 }
   0x6   : > { %p32_p0 = scmp.ge.s32.totalorder %s30_s26, 2  ;;  %p172_p1 = scmp.ne.s32.totalorder %s815_s20, %s811_s19 }
   0x7   : > { %p173_p2 = scmp.eq.s32.totalorder %s607_s24, 1  ;;  %p178_p3 = scmp.ne.s32.totalorder %s811_s19, %s807_s18 }
   0x8   : > { %s1070_s26 = smov (%p32_p0, %s30_s26), 0  ;;  %p179_p5 = scmp.eq.s32.totalorder %s608_s25, 1 }
   0x9   : > { %p902_p4 = por %p173_p2, %p172_p1  ;;  %s159_s29 = ssub.s32 %s823_s22, %s1070_s26 }
   0xa   : > { %p614_p6 = scmp.ge.s32.totalorder %s827_s23, 1  ;;  %p160_p7 = scmp.eq.s32.totalorder %s159_s29, 0 }
   0xb   : > { %p909_p8 = por %p179_p5, %p178_p3  ;;  %p229_p9 = scmp.lt.s32.totalorder %s827_s23, 3 }
   0xc   : > { %s915_s6 = scalar_select %p160_p7, %s815_s20, %s162_s27  }
   0xd   : > { %p230_p10 = pnand %p614_p6, %p229_p9 }
   0xe   : > { %p268_p11 = scmp.lt.s32.totalorder (!%p230_p10), %s819_s21, 1  ;;  %s265_s9 = sand.u32 (!%p230_p10), 1, %s811_s19  }
   0xf   : > { %233 = sbr.rel (%p230_p10) target bundleno = 462 (0x1ce), region = 40  ;;  %s485_s25 = scalar_lea.sflag (!%p230_p10), [#allocation4], %s265_s9 }
  0x10   : > { %s831_s29 = smov (!%p230_p10), [#allocation3]  }
  0x11   : > { %s755_s7 = sshll.u32 (!%p230_p10), %s831_s29, 4  ;;  %s756_s7 = int_to_ptr.vmem [resolvable:$false] %s755_s7 }
  0x14   : > { %v295_v0 = vld [vmem:[%s1057_s1 + $0x18] sm:$0xff]  ;;  %v829_v1 = vmov 0.0   ;;  %v294_v2 = vld [vmem:[%s1057_s1 + $0x10] sm:$0xff]  ;;  %vm830_vm0 = vmmov 0   ;;  %vm289_vm1 = vcmask 261120   ;;  %s269_s13 = scalar_select %p268_p11, %s819_s21, 1 }
  0x15   : > { %646 = vmatprep.subr.mxu0 %v829_v1  ;;  %654 = vmatprep.mubr.msk.f32.mxu0 %vm830_vm0, %v829_v1  ;;  %v398_v3 = vld [vmem:[%s1059_s3 + $0x78] sm:$0xff]  ;;  %290 = vst.msk [vmem:[#allocation2] sm:$0xff] %vm289_vm1, %v829_v1  ;;  %v397_v4 = vld [vmem:[%s1059_s3 + $0x70] sm:$0xff]  ;;  %v293_v5 = vld [vmem:[%s1057_s1 + $0x8] sm:$0xff] }
  0x16   : > { %647 = vmatpush3.msra.mxu0 %v295_v0  ;;  %657 = vmatprep.subr.mxu1 %v829_v1  ;;  %s616_s24 = sshll.u32 %s269_s13, 3  ;;  %v396_v6 = vld [vmem:[%s1059_s3 + $0x68] sm:$0xff]  ;;  %v292_v7 = vld [vmem:[%s1057_s1] sm:$0xff]  ;;  %v394_v10 = vld [vmem:[%s1059_s3 + $0x58] sm:$0xff]  ;;  %s621_s13 = sshll.u32 %s819_s21, 7 }
  0x17   : > { %648 = vmatprep.subr.mxu0 %v829_v1  ;;  %658 = vmatpush3.msra.mxu1 %v398_v3  ;;  %s271_s10 = scalar_lea.vmem %s1056_s0, %s616_s24  ;;  %v395_v9 = vld [vmem:[%s1059_s3 + $0x60] sm:$0xff]  ;;  %v393_v11 = vld [vmem:[%s1059_s3 + $0x50] sm:$0xff]  ;;  %v392_v12 = vld [vmem:[%s1059_s3 + $0x48] sm:$0xff]  ;;  %s496_s24 = scalar_lea.hbm %s1061_s5, %s621_s13 }
  0x18   : > { %649 = vmatpush3.msra.mxu0 %v294_v2  ;;  %659 = vmatprep.subr.mxu1 %v829_v1  ;;  %v291_v8 = vld [vmem:[%s271_s10] sm:$0xff]  ;;  %v390_v14 = vld [vmem:[%s1059_s3 + $0x38] sm:$0xff]  ;;  %v389_v15 = vld [vmem:[%s1059_s3 + $0x30] sm:$0xff]  ;;  %s615_s10 = sshll.u32 %s265_s9, 3  ;;  %s757_s21 = scalar_lea.vmem %s756_s7, 256 }
  0x19   : > { %650 = vmatprep.subr.mxu0 %v829_v1  ;;  %660 = vmatpush3.msra.mxu1 %v397_v4  ;;  %v391_v13 = vld [vmem:[%s1059_s3 + $0x40] sm:$0xff]  ;;  %v388_v16 = vld [vmem:[%s1059_s3 + $0x28] sm:$0xff]  ;;  %v386_v18 = vld [vmem:[%s1059_s3 + $0x18] sm:$0xff]  ;;  %s267_s14 = scalar_lea.vmem [#allocation3], %s615_s10 }
  0x1a   : > { %651 = vmatpush3.msra.mxu0 %v293_v5  ;;  %661 = vmatprep.subr.mxu1 %v829_v1  ;;  %v387_v17 = vld [vmem:[%s1059_s3 + $0x20] sm:$0xff]  ;;  %v385_v19 = vld [vmem:[%s1059_s3 + $0x10] sm:$0xff]  ;;  %v384_v20 = vld [vmem:[%s1059_s3 + $0x8] sm:$0xff]  ;;  %s498_s15 = sshll.u32 %s267_s14, 4  ;;  %s499_s15 = int_to_ptr.vmem [resolvable:$true] %s498_s15 }
  0x1b   : > { %652 = vmatprep.subr.mxu0 %v829_v1  ;;  %662 = vmatpush3.msra.mxu1 %v396_v6  ;;  %v383_v21 = vld [vmem:[%s1059_s3] sm:$0xff]  ;;  %s751_s27 = scalar_lea.vmem %s499_s15, 128  ;;  %p758_p1 = scmp.lt.s32.totalorder %s499_s15, %s756_s7 }
  0x1c   : > { %653 = vmatpush3.msra.mxu0 %v292_v7  ;;  %663 = vmatprep.subr.mxu1 %v829_v1  ;;  %v617_v22 = vld [vmem:[%s1058_s2] ss:$0 sm:$0xff]  ;;  %p752_p12 = scmp.ne.s32.totalorder %s499_s15, %s751_s27  ;;  %p759_p2 = scmp.lt.s32.totalorder %s757_s21, %s751_s27 }
  0x1d   : > { %655 = vmatmul.mubr.msk.f32.vlgmr.msra.gmra.mxu0 %vm289_vm1, %v291_v8  ;;  %664 = vmatpush3.msra.mxu1 %v395_v9  ;;  %v382_v31 = vld [vmem:[#allocation2] sm:$0xff] }
  0x1e   : > { %665 = vmatprep.subr.mxu1 %v829_v1  ;;  %689 = vmatprep.mubr.msk.f32.mxu1 %vm830_vm0, %v829_v1  ;;  %v619_v35 = vld [vmem:[%s1060_s4] ss:$0 sm:$0xff]  ;;  %p753_p13 = pnand %p752_p12, %p902_p4  ;;  %p760_p3 = por %p759_p2, %p758_p1 }
  0x1f   : > { %666 = vmatpush3.msra.mxu1 %v394_v10 }
  0x20   : > { %667 = vmatprep.subr.mxu1 %v829_v1  ;;  %p754_p0 = pneg %p753_p13 }
  0x21   : > { %668 = vmatpush3.msra.mxu1 %v393_v11 }
  0x22   : > { %669 = vmatprep.subr.mxu1 %v829_v1  ;;  %p761_p5 = pnand %p760_p3, %p754_p0 }
  0x23   : > { %670 = vmatpush3.msra.mxu1 %v392_v12 }
  0x24   : > { %671 = vmatprep.subr.mxu1 %v829_v1 }
  0x25   : > { %672 = vmatpush3.msra.mxu1 %v391_v13 }
  0x26   : > { %673 = vmatprep.subr.mxu1 %v829_v1 }
  0x27   : > { %674 = vmatpush3.msra.mxu1 %v390_v14 }
  0x28   : > { %675 = vmatprep.subr.mxu1 %v829_v1 }
  0x29   : > { %676 = vmatpush3.msra.mxu1 %v389_v15 }
  0x2a   : > { %677 = vmatprep.subr.mxu1 %v829_v1 }
  0x2b   : > { %678 = vmatpush3.msra.mxu1 %v388_v16 }
  0x2c   : > { %679 = vmatprep.subr.mxu1 %v829_v1 }
  0x2d   : > { %680 = vmatpush3.msra.mxu1 %v387_v17 }
  0x2e   : > { %681 = vmatprep.subr.mxu1 %v829_v1 }
  0x2f   : > { %682 = vmatpush3.msra.mxu1 %v386_v18 }
  0x30   : > { %683 = vmatprep.subr.mxu1 %v829_v1 }
  0x31   : > { %684 = vmatpush3.msra.mxu1 %v385_v19 }
  0x32   : > { %685 = vmatprep.subr.mxu1 %v829_v1 }
  0x33   : > { %686 = vmatpush3.msra.mxu1 %v384_v20 }
  0x34   : > { %687 = vmatprep.subr.mxu1 %v829_v1 }
  0x35   : > { %688 = vmatpush3.msra.mxu1 %v383_v21 }
  0xdd   : > { %v373_v23 = vpop.f32.mrf.mxu0 }
  0xde   : > { %v374_v24 = vadd.f32 %v617_v22, %v373_v23 }
  0xdf   : > { %v656_v25 = vpop.f32.mrf.mxu0 }
  0xe0   : > { %v378_v26 = vmul.f32 0.70710677, %v374_v24  ;;  %v377_v28 = vmul.f32 0.5, %v374_v24 }
  0xe2   : > { %749 = verf.f32 %v378_v26 }
  0xef   : > { %v750_v27 = vpop.eup %749 }
  0xf0   : > { %v380_v29 = vadd.f32 1.0, %v750_v27 }
  0xf2   : > { %v381_v30 = vmul.f32 %v380_v29, %v377_v28 }
  0xf4   : > { %690 = vmatmul.mubr.f32.vlgmr.msra.gmra.mxu1 %v381_v30 }
 0x1b4   : > { %v465_v32 = vpop.f32.mrf.mxu1 }
 0x1b5   : > { %v469_v33 = vadd.f32 %v465_v32, %v382_v31 }
 0x1b6   : > { %v691_v34 = vpop.f32.mrf.mxu1 }
 0x1b7   : > { %470 = vst.msk [vmem:[#allocation2] sm:$0xff] %vm289_vm1, %v469_v33 }
 0x1be   : > { %v474_v36 = vld [vmem:[#allocation2] sm:$0xff] }
 0x1bf   : > { %v482_v37 = vadd.f32 %v619_v35, %v474_v36 }
 0x1c1   : > { %483 = vst.msk [vmem:[%s267_s14] sm:$0xff] %vm289_vm1, %v482_v37 }
 0x1c2   : > { %764 = shalt.err (!%p761_p5)
}
 0x1c3   : > { %s765_s8 = scalar_lea.hbm %s496_s24, 128  ;;  %s769_s11 = scalar_lea.hbm %s1061_s5, 256 }
 0x1c4   : > { %p766_p6 = scmp.ne.s32.totalorder %s496_s24, %s765_s8  ;;  %p770_p10 = scmp.lt.s32.totalorder %s496_s24, %s1061_s5 }
 0x1c5   : > { %p771_p11 = scmp.lt.s32.totalorder %s769_s11, %s765_s8 }
 0x1c6   : > { %p767_p7 = pnand %p766_p6, %p902_p4 }
 0x1c7   : > { %p772_p12 = por %p771_p11, %p770_p10 }
 0x1c8   : > { %p768_p9 = pneg %p767_p7 }
 0x1ca   : > { %p773_p13 = pnand %p772_p12, %p768_p9 }
 0x1cc   : > { %776 = shalt.err (!%p773_p13)
}
 0x1cd   : > { %692 = dma.vmem_to_hbm [thread:$0]  (%p902_p4), %s499_s15, 128, %s496_s24, %s485_s25  }
 0x1ce PF: > { %p698_p0 = scmp.ge.s32.totalorder %s827_s23, 2  ;;  %s510_s14 = sand.u32 1, %s807_s18  }
 0x1cf   : > { %s511_s16 = scalar_lea.sflag [#allocation4], %s510_s14 }
 0x1d0   : > { %p695_p1 = pnand %p698_p0, %p909_p8 }
 0x1d2   : > { %p696_p2 = pneg %p695_p1 }
 0x1d4   : > { %802 = dma.done.wait (%p696_p2), %s511_s16, 128  }
 0x1d5   : > { %804 = vsyncadd (%p696_p2), %s511_s16, 4294967168  ;;  %s18_s23 = sadd.s32 1, %s827_s23   ;;  %s1064_s18 = smov %s811_s19 }
 0x1d6   : > { %p15_p3 = scmp.ge.s32.totalorder %s18_s23, 4   ;;  %s1065_s19 = smov %s815_s20 }
 0x1d7   : > { %s1066_s20 = smov %s915_s6  ;;  %s1067_s21 = smov %s823_s22 }
 0x1d8   : > { %s1068_s22 = smov %s1070_s26  ;;  %17 = sbr.rel (!%p15_p3) target bundleno = 4 (0x4), region = 92 }
 0x1dd   :  { %516 = vsyncpa [#allocation4], 1 }
 0x1de   :  { %518 = vsyncpa [#allocation4 + $0x1], 1 }

</bundles_post_ra>
